<compile_context>
chip_gen: v7x
topology: tpu7x:2x2x1
jax: 0.10.0
libtpu: 0.0.40
codegen_flags: <defaults>
</compile_context>

<pallas_src>
import functools

import jax
import jax.numpy as jnp
from jax.experimental import pallas as pl
from jax.experimental.pallas import tpu as pltpu


def _sig2spike_kernel(sig_ref, rand_ref, spk_ref, cnt_ref, *, norm_level):
    """Threshold one time tile.

    sig_ref : VMEM (C, TS)      un-repeated analog signal tile
    rand_ref: VMEM (tw, C, TS)  uniform [0, 1) randoms (one slab per repeat)
    spk_ref : VMEM (tw, C, TS)  output spikes
    cnt_ref : VMEM (1, 1)       per-tile spike count (partial sum)
    """
    sig = sig_ref[...]                                   # (C, TS)
    rand = rand_ref[...] * jnp.float32(norm_level)       # (tw, C, TS)
    cond = rand < sig[None, :, :]                        # fused tw-repeat via broadcast
    spk_ref[...] = cond.astype(spk_ref.dtype)
    # Spikes are {0, 1}; no abs() needed. Padded columns hold -inf signal and
    # therefore never spike, so the partial count is exact.
    cnt_ref[...] = jnp.broadcast_to(jnp.sum(cond.astype(jnp.float32)), (1, 1))


def _pick_time_tile(time_steps, channels, tw, *, max_block_bytes=2 << 20):
    """Lane-aligned time-tile length; biggest block under a per-buffer budget."""
    ts = max_block_bytes // (4 * tw * max(channels, 1))
    ts = max(128, min(ts, 8192))
    ts -= ts % 128
    t_ceil = ((time_steps + 127) // 128) * 128   # never tile beyond padded length
    return min(ts, t_ceil)


def sig2spike_layer(signal, *, tw=1, norm_level=1.0, spk_out=True, key=None,
                    out_dtype=jnp.float32):
    """JAX/Pallas equivalent of Sig2SpikeLayer.forward.

    signal: (channels, time_steps) float array.
    Returns (spk_sig, spikes_number) with spk_sig of shape (tw*time, channels).
    """
    signal = jnp.asarray(signal, dtype=jnp.float32)
    channels, time_steps = signal.shape

    if not spk_out:
        # Reference branch: pass-through (up-sampled, transposed) analog signal.
        sig = jnp.repeat(signal, tw, axis=1) if tw != 1 else signal
        sig_tc = sig.T
        return sig_tc, jnp.sum(jnp.abs(sig_tc))

    if key is None:
        key = jax.random.PRNGKey(0)

    ts = _pick_time_tile(time_steps, channels, tw)
    num_tiles = pl.cdiv(time_steps, ts)
    t_pad = num_tiles * ts

    # Pad signal time axis with -inf: padded positions can never spike, so both
    # the spike map (sliced off below) and the partial counts stay exact.
    if t_pad != time_steps:
        sig_p = jnp.pad(signal, ((0, 0), (0, t_pad - time_steps)),
                        constant_values=-jnp.inf)
    else:
        sig_p = signal

    # torch.rand equivalent, laid out lane-dense as (tw, C, T_pad).
    rand = jax.random.uniform(key, (tw, channels, t_pad), dtype=jnp.float32)

    kernel = functools.partial(_sig2spike_kernel, norm_level=float(norm_level))
    spk3, cnt = pl.pallas_call(
        kernel,
        grid=(num_tiles,),
        out_shape=(
            jax.ShapeDtypeStruct((tw, channels, t_pad), out_dtype),
            jax.ShapeDtypeStruct((num_tiles, 1), jnp.float32),
        ),
        in_specs=[
            pl.BlockSpec((channels, ts), lambda i: (0, i)),        # signal tile
            pl.BlockSpec((tw, channels, ts), lambda i: (0, 0, i)),  # randoms
        ],
        out_specs=(
            pl.BlockSpec((tw, channels, ts), lambda i: (0, 0, i)),  # spikes
            pl.BlockSpec((1, 1), lambda i: (i, 0)),                 # partial count
        ),
        compiler_params=pltpu.CompilerParams(
            dimension_semantics=("parallel",)),
    )(sig_p, rand)

    # (tw, C, T_pad) -> slice valid time -> (T, tw, C) -> (tw*T, C)
    spk_sig = jnp.transpose(spk3[:, :, :time_steps], (2, 0, 1))
    spk_sig = spk_sig.reshape(tw * time_steps, channels)
    spikes_number = jnp.sum(cnt)
    return spk_sig, spikes_number


if __name__ == "__main__":
    key = jax.random.PRNGKey(0)
    sig_key, rand_key = jax.random.split(key)

    channels_in = 4
    time_steps = 16
    tw = 2
    norm_level = 1.0

    # Analog signal in [0, 1) so spike probabilities are meaningful.
    signal = jax.random.uniform(sig_key, (channels_in, time_steps), dtype=jnp.float32)

    spk_sig, spikes_number = sig2spike_layer(
        signal, tw=tw, norm_level=norm_level, spk_out=True, key=rand_key
    )
    spk_sig = jax.block_until_ready(spk_sig)
    spikes_number = jax.block_until_ready(spikes_number)

    # Sanity checks on semantics (shape, binary values, count consistency).
    assert spk_sig.shape == (tw * time_steps, channels_in)
    assert bool(jnp.all((spk_sig == 0.0) | (spk_sig == 1.0)))
    assert bool(jnp.isclose(spikes_number, jnp.sum(spk_sig)))

    # spk_out=False passthrough branch.
    sig_pass, n_pass = sig2spike_layer(signal, tw=tw, spk_out=False)
    assert sig_pass.shape == (tw * time_steps, channels_in)
    assert bool(jnp.isclose(n_pass, jnp.sum(jnp.abs(sig_pass))))

    print("KERNEL_OK")
</pallas_src>

<mosaic_0001>
module attributes {stable_mosaic.version = 11 : i64} {
  func.func @_sig2spike_kernel(%arg0: i32, %arg1: memref<4x128xf32, #tpu.memory_space<vmem>>, %arg2: memref<2x4x128xf32, #tpu.memory_space<vmem>>, %arg3: memref<2x4x128xf32, #tpu.memory_space<vmem>>, %arg4: memref<1x1xf32, #tpu.memory_space<vmem>>) attributes {dimension_semantics = [#tpu.dimension_semantics<parallel>], iteration_bounds = array<i64: 1>, scalar_prefetch = 0 : i64, scratch_operands = 0 : i64, tpu.core_type = #tpu.core_type<tc>, window_params = [{transform_indices = @transform_0, window_bounds = array<i64: 4, 128>}, {transform_indices = @transform_1, window_bounds = array<i64: 2, 4, 128>}, {transform_indices = @transform_2, window_bounds = array<i64: 2, 4, 128>}, {transform_indices = @transform_3, window_bounds = array<i64: 1, 1>}]} {
    %c0 = arith.constant 0 : index
    %c0_0 = arith.constant 0 : index
    %0 = vector.load %arg1[%c0, %c0_0] : memref<4x128xf32, #tpu.memory_space<vmem>>, vector<4x128xf32>
    %c0_1 = arith.constant 0 : index
    %c0_2 = arith.constant 0 : index
    %c0_3 = arith.constant 0 : index
    %1 = vector.load %arg2[%c0_1, %c0_2, %c0_3] : memref<2x4x128xf32, #tpu.memory_space<vmem>>, vector<2x4x128xf32>
    %cst = arith.constant 1.000000e+00 : f32
    %2 = vector.broadcast %cst : f32 to vector<2x4x128xf32>
    %3 = arith.mulf %1, %2 : vector<2x4x128xf32>
    %4 = vector.shape_cast %0 : vector<4x128xf32> to vector<1x4x128xf32>
    %5 = vector.broadcast %4 : vector<1x4x128xf32> to vector<2x4x128xf32>
    %6 = arith.cmpf olt, %3, %5 : vector<2x4x128xf32>
    %7 = arith.extui %6 : vector<2x4x128xi1> to vector<2x4x128xi32>
    %8 = arith.sitofp %7 : vector<2x4x128xi32> to vector<2x4x128xf32>
    %c0_4 = arith.constant 0 : index
    %c0_5 = arith.constant 0 : index
    %c0_6 = arith.constant 0 : index
    %9 = vector.load %arg3[%c0_4, %c0_5, %c0_6] : memref<2x4x128xf32, #tpu.memory_space<vmem>>, vector<2x4x128xf32>
    tpu.vector_store %arg3[%c0_4, %c0_5, %c0_6], %8 {strides = array<i32>} : memref<2x4x128xf32, #tpu.memory_space<vmem>>, vector<2x4x128xf32>,
    %10 = arith.extui %6 : vector<2x4x128xi1> to vector<2x4x128xi32>
    %11 = arith.sitofp %10 : vector<2x4x128xi32> to vector<2x4x128xf32>
    %12 = vector.shape_cast %11 : vector<2x4x128xf32> to vector<1x2x4x128xf32>
    %cst_7 = arith.constant dense<0.000000e+00> : vector<1xf32>
    %13 = vector.multi_reduction <add>, %12, %cst_7 [1, 2, 3] : vector<1x2x4x128xf32> to vector<1xf32>
    %14 = vector.shape_cast %13 : vector<1xf32> to vector<1x1x1x1xf32>
    %15 = vector.extract %14[0, 0, 0, 0] : f32 from vector<1x1x1x1xf32>
    %16 = vector.broadcast %15 : f32 to vector<1x1xf32>
    %c0_8 = arith.constant 0 : index
    %c0_9 = arith.constant 0 : index
    %17 = vector.load %arg4[%c0_8, %c0_9] : memref<1x1xf32, #tpu.memory_space<vmem>>, vector<1x1xf32>
    tpu.vector_store %arg4[%c0_8, %c0_9], %16 {strides = array<i32>} : memref<1x1xf32, #tpu.memory_space<vmem>>, vector<1x1xf32>,
    return
  }
  func.func @transform_0(%arg0: i32) -> (i32, i32) {
    %c0_i32 = arith.constant 0 : i32
    %c0_i32_0 = arith.constant 0 : i32
    return %c0_i32, %arg0 : i32, i32
  }
  func.func @transform_1(%arg0: i32) -> (i32, i32, i32) {
    %c0_i32 = arith.constant 0 : i32
    %c0_i32_0 = arith.constant 0 : i32
    %c0_i32_1 = arith.constant 0 : i32
    return %c0_i32, %c0_i32_0, %arg0 : i32, i32, i32
  }
  func.func @transform_2(%arg0: i32) -> (i32, i32, i32) {
    %c0_i32 = arith.constant 0 : i32
    %c0_i32_0 = arith.constant 0 : i32
    %c0_i32_1 = arith.constant 0 : i32
    return %c0_i32, %c0_i32_0, %arg0 : i32, i32, i32
  }
  func.func @transform_3(%arg0: i32) -> (i32, i32) {
    %c0_i32 = arith.constant 0 : i32
    %c0_i32_0 = arith.constant 0 : i32
    return %arg0, %c0_i32 : i32, i32
  }
}

</mosaic_0001>

<bundles_post_ra>
// kernel: tpu_custom_call.1
= control target key start
LH: loop header
LB: loop body
LE: loop exit
PB: predicated region body
PF: predicated region fallthrough
CT: control target
= control target key end

     0   :  { %9 = vsyncpa [#allocation3], 0  ;;  %s295_s0 = inlined_call_operand.hbm [shape: f32[4,128], index: 0, kind: input, shape index: {}]   ;;  %s296_s1 = inlined_call_operand.hbm [shape: f32[2,4,128], index: 1, kind: input, shape index: {}]   ;;  %s297_s2 = inlined_call_operand.hbm [shape: f32[2,4,128], index: 2, kind: output, shape index: {0}]   ;;  %s298_s3 = inlined_call_operand.hbm [shape: f32[1,1], index: 3, kind: output, shape index: {1}]  }
   0x1   :  { %10 = vsyncpa [#allocation6], 0 }
   0x2   :  { %11 = vsyncpa [#allocation4], 0 }
   0x3   :  { %12 = vsyncpa [#allocation9], 0  ;;  %s207_s12 = smov [#allocation2]   ;;  %s208_s14 = smov [#allocation5]  }
   0x4   :  { %s19_s13 = sshll.u32 %s207_s12, 4  ;;  %s28_s15 = sshll.u32 %s208_s14, 4  ;;  %s20_s13 = int_to_ptr.vmem [resolvable:$true] %s19_s13  ;;  %s234_s15 = int_to_ptr.vmem [resolvable:$true] %s28_s15 }
   0x5   :  { %s111_s18 = scalar_lea.hbm %s295_s0, 64 }
   0x6   :  { %p112_p0 = scmp.ne.s32.totalorder %s295_s0, %s111_s18  ;;  %p115_p1 = scmp.lt.u32.totalorder %s111_s18, %s295_s0 }
   0x8   :  { %p117_p2 = pnand %p115_p1, %p112_p0 }
   0xa   :  { %120 = shalt.err (!%p117_p2)
}
   0xb   :  { %s121_s23 = scalar_lea.vmem %s20_s13, 64  ;;  %p126_p4 = scmp.lt.s32.totalorder %s20_s13, %s20_s13 }
   0xc   :  { %p122_p3 = scmp.ne.s32.totalorder %s20_s13, %s121_s23  ;;  %p127_p5 = scmp.lt.s32.totalorder %s121_s23, %s121_s23 }
   0xe   :  { %p128_p6 = por %p127_p5, %p126_p4 }
  0x10   :  { %p129_p7 = pnand %p128_p6, %p122_p3 }
  0x12   :  { %132 = shalt.err (!%p129_p7)
}
  0x13   :  { %22 = dma.hbm_to_vmem [thread:$0]  %s295_s0, 64, %s20_s13, [#allocation3]  }
  0x14   :  { %s133_s28 = scalar_lea.hbm %s296_s1, 128 }
  0x15   :  { %p134_p8 = scmp.ne.s32.totalorder %s296_s1, %s133_s28  ;;  %p137_p9 = scmp.lt.u32.totalorder %s133_s28, %s296_s1 }
  0x17   :  { %p139_p10 = pnand %p137_p9, %p134_p8 }
  0x19   :  { %142 = shalt.err (!%p139_p10)
}
  0x1a   :  { %s143_s6 = scalar_lea.vmem %s234_s15, 128  ;;  %p148_p12 = scmp.lt.s32.totalorder %s234_s15, %s234_s15 }
  0x1b   :  { %p144_p11 = scmp.ne.s32.totalorder %s234_s15, %s143_s6  ;;  %p149_p13 = scmp.lt.s32.totalorder %s143_s6, %s143_s6 }
  0x1d   :  { %p150_p0 = por %p149_p13, %p148_p12 }
  0x1f   :  { %p151_p1 = pnand %p150_p0, %p144_p11 }
  0x21   :  { %154 = shalt.err (!%p151_p1)
}
  0x22   :  { %s209_s0 = smov 64   ;;  %s210_s7 = smov 4  }
  0x23   :  { %34 = dma.hbm_to_vmem [thread:$0]  %s296_s1, 128, %s234_s15, [#allocation6], %s209_s0, %s209_s0, %s210_s7  }
  0x24   :  { %199 = dma.done.wait [#allocation3], 64  }
  0x25   :  { %200 = vsyncadd [#allocation3], 4294967232 }
  0x26   :  { %201 = dma.done.wait [#allocation6], 128  }
  0x27   :  { %202 = vsyncadd [#allocation6], 4294967168  ;;  %vm52_vm0 = vcmask 1043456   ;;  %v41_v0 = vld [vmem:[#allocation2] sm:$0xf]  ;;  %v211_v3 = vmov 0.0  }
  0x28   :  { %v42_v1 = vld [vmem:[#allocation5] sm:$0xf]  ;;  %v43_v2 = vld [vmem:[#allocation5 + $0x4] sm:$0xf]  ;;  %s212_s1 = smov [#allocation7]  }
  0x29   :  { %vm44_vm1 = vcmp.lt.f32.partialorder %v42_v1, %v41_v0  ;;  %vm45_vm2 = vcmp.lt.f32.partialorder %v43_v2, %v41_v0  ;;  %s73_s10 = sshll.u32 %s212_s1, 4  ;;  %s74_s10 = int_to_ptr.vmem [resolvable:$true] %s73_s10 }
  0x2a   :  { %v100_v4 = vsel %vm44_vm1, 1.0, %v211_v3  ;;  %v101_v5 = vsel %vm45_vm2, 1.0, %v211_v3  ;;  %s155_s11 = scalar_lea.vmem %s74_s10, 128  ;;  %p160_p3 = scmp.lt.s32.totalorder %s74_s10, %s74_s10 }
  0x2b   :  { %50 = vst [vmem:[#allocation7] sm:$0xf] %v100_v4  ;;  %51 = vst [vmem:[#allocation7 + $0x4] sm:$0xf] %v101_v5  ;;  %v53_v6 = vsel %vm52_vm0, %v100_v4, 0.0  ;;  %v54_v7 = vsel %vm52_vm0, %v101_v5, 0.0  ;;  %p156_p2 = scmp.ne.s32.totalorder %s74_s10, %s155_s11  ;;  %p161_p4 = scmp.lt.s32.totalorder %s155_s11, %s155_s11 }
  0x2c   :  { %v55_v8 = vadd.f32 %v54_v7, %v53_v6 }
  0x2d   :  { %p162_p5 = por %p161_p4, %p160_p3 }
  0x2e   :  { %56 = vadd.xlane.f32.xlu0 %v55_v8 }
  0x2f   :  { %p163_p6 = pnand %p162_p5, %p156_p2 }
  0x31   :  { %166 = shalt.err (!%p163_p6)
}
  0x32   :  { %s167_s14 = scalar_lea.hbm %s297_s2, 128 }
  0x33   :  { %p168_p7 = scmp.ne.s32.totalorder %s297_s2, %s167_s14  ;;  %p171_p8 = scmp.lt.u32.totalorder %s167_s14, %s297_s2 }
  0x35   :  { %p173_p9 = pnand %p171_p8, %p168_p7 }
  0x37   :  { %176 = shalt.err (!%p173_p9)
}
  0x38   :  { %79 = dma.vmem_to_hbm [thread:$0]  %s74_s10, 128, %s297_s2, [#allocation4], %s209_s0, %s209_s0, %s210_s7   ;;  %vm66_vm3 = vcmask 0  }
  0x39   :  { %s213_s21 = smov [#allocation8]  }
  0x3a   :  { %s86_s22 = sshll.u32 %s213_s21, 4  ;;  %s87_s22 = int_to_ptr.vmem [resolvable:$true] %s86_s22 }
  0x3b   :  { %s177_s24 = scalar_lea.vmem %s87_s22, 16  ;;  %s181_s25 = scalar_lea.vmem %s87_s22, 32 }
  0x3c   :  { %p178_p10 = scmp.ne.s32.totalorder %s87_s22, %s177_s24  ;;  %p182_p11 = scmp.lt.s32.totalorder %s87_s22, %s87_s22 }
  0x3d   :  { %p183_p12 = scmp.lt.s32.totalorder %s181_s25, %s177_s24 }
  0x3f   :  { %p184_p13 = por %p183_p12, %p182_p11 }
  0x41   :  { %p185_p0 = pnand %p184_p13, %p178_p10 }
  0xbb   :  { %v57_v9 = vpop.xlane.xlu0 %56 }
  0xbc   :  { %v58_v10 = vrot.slane %v57_v9, 4 }
  0xbe   :  { %v59_v11 = vadd.f32 %v58_v10, %v57_v9 }
  0xc0   :  { %v60_v12 = vrot.slane %v59_v11, 2 }
  0xc2   :  { %v61_v13 = vadd.f32 %v60_v12, %v59_v11 }
  0xc4   :  { %v62_v14 = vrot.slane %v61_v13, 1 }
  0xc6   :  { %v63_v15 = vadd.f32 %v62_v14, %v61_v13 }
  0xc8   :  { %102 = vpush %v63_v15 }
  0xf9   :  { %s103_s23 = spop %102 }
  0xfa   :  { %v65_v16 = vstv %s103_s23 }
  0xfb   :  { %67 = vst.msk [vmem:[#allocation8] sm:$0x1] %vm66_vm3, %v65_v16 }
  0xfc   :  { %188 = shalt.err (!%p185_p0)
}
  0xfd   :  { %s189_s27 = scalar_lea.hbm %s298_s3, 16 }
  0xfe   :  { %p190_p1 = scmp.ne.s32.totalorder %s298_s3, %s189_s27  ;;  %p193_p2 = scmp.lt.u32.totalorder %s189_s27, %s298_s3 }
 0x100   :  { %p195_p3 = pnand %p193_p2, %p190_p1 }
 0x102   :  { %198 = shalt.err (!%p195_p3)
}
 0x103   :  { %89 = dma.vmem_to_hbm [thread:$0]  %s87_s22, 16, %s298_s3, [#allocation9]  }
 0x104   :  { %203 = dma.done.wait [#allocation4], 128  }
 0x105   :  { %204 = vsyncadd [#allocation4], 4294967168 }
 0x106   :  { %205 = dma.done.wait [#allocation9], 16  }
 0x107   :  { %206 = vsyncadd [#allocation9], 4294967280 }
 0x108   :  { %96 = vsyncpa [#allocation3], 1 }
 0x109   :  { %97 = vsyncpa [#allocation6], 1 }
 0x10a   :  { %98 = vsyncpa [#allocation4], 1 }
 0x10b   :  { %99 = vsyncpa [#allocation9], 1 }

</bundles_post_ra>
